<compile_context>
chip_gen: v7x
topology: tpu7x:2x2x1
jax: 0.10.0
libtpu: 0.0.40
codegen_flags: <defaults>
</compile_context>

<pallas_src>
import jax
import jax.numpy as jnp
from jax import lax
from jax.experimental import pallas as pl
from jax.experimental.pallas import tpu as pltpu


# ----------------------------------------------------------------------------
# Pre-pass: fused row L2-normalization (+ dtype cast for the MXU path).
# ----------------------------------------------------------------------------
def _normalize_kernel(x_ref, o_ref):
    # F.normalize(x, dim=1): x / max(||x||, 1e-12) == x * rsqrt(max(sum x^2, 1e-24))
    x = x_ref[...].astype(jnp.float32)
    ssq = jnp.sum(x * x, axis=1, keepdims=True)
    o_ref[...] = (x * lax.rsqrt(jnp.maximum(ssq, 1e-24))).astype(o_ref.dtype)


def _l2_normalize(x, out_dtype, block_rows):
    n, d = x.shape
    return pl.pallas_call(
        _normalize_kernel,
        out_shape=jax.ShapeDtypeStruct((n, d), out_dtype),
        grid_spec=pltpu.PrefetchScalarGridSpec(
            num_scalar_prefetch=0,
            grid=(n // block_rows,),
            in_specs=[pl.BlockSpec((block_rows, d), lambda i: (i, 0))],
            out_specs=pl.BlockSpec((block_rows, d), lambda i: (i, 0)),
        ),
        compiler_params=pltpu.CompilerParams(dimension_semantics=("parallel",)),
    )(x)


# ----------------------------------------------------------------------------
# Main kernel: tiled NT matmuls + row/column logsumexp statistics.
# ----------------------------------------------------------------------------
def _make_clip_loss_kernel(temperature: float, use_fixed_max: bool):
    inv_temp = 1.0 / temperature
    # Contract the feature axis of both operands (NT matmul): no transposes.
    nt_dims = (((1,), (1,)), ((), ()))

    def _diag(a_k, b_k):
        # diag[i] = <a_i, b_i>/T computed in f32 from the resident row panels.
        return jnp.sum(a_k.astype(jnp.float32) * b_k.astype(jnp.float32),
                       axis=1, keepdims=True) * inv_temp

    if use_fixed_max:
        # |logits| <= 1/T because rows are L2-normalized, so m = 1/T is a valid
        # (and exact) logsumexp shift. Far-from-max terms may underflow to 0,
        # which is harmless for the LSE value as long as the max term itself
        # does not (guaranteed for T >= ~0.03; otherwise the online-max
        # fallback below is selected).
        def kernel(a_k_ref, a_l_ref, b_k_ref, b_l_ref,          # inputs
                   logits_ref, row_lse_ref, col_lse_ref, diag_ref,  # outputs
                   s0_ref, s1_ref):                              # VMEM scratch
            l_idx = pl.program_id(1)
            n_col_blocks = pl.num_programs(1)

            @pl.when(l_idx == 0)
            def _init():
                s0_ref[...] = jnp.zeros_like(s0_ref)
                s1_ref[...] = jnp.zeros_like(s1_ref)

            a_k = a_k_ref[...]   # out0 rows, block k  (bm, D)
            a_l = a_l_ref[...]   # out0 rows, block l  (bn, D)
            b_k = b_k_ref[...]   # out1 rows, block k  (bm, D)
            b_l = b_l_ref[...]   # out1 rows, block l  (bn, D)

            # logits tile (k,l):  a_k @ b_l^T / T  -> rows of logits
            logits = lax.dot_general(a_k, b_l, nt_dims,
                                     preferred_element_type=jnp.float32) * inv_temp
            # logits^T tile (k,l): b_k @ a_l^T / T -> rows of logits^T
            logits_t = lax.dot_general(b_k, a_l, nt_dims,
                                       preferred_element_type=jnp.float32) * inv_temp

            logits_ref[...] = logits.astype(logits_ref.dtype)

            # Fixed-max LSE accumulation (lane-wise reductions only).
            s0_ref[...] += jnp.sum(jnp.exp(logits - inv_temp), axis=1, keepdims=True)
            s1_ref[...] += jnp.sum(jnp.exp(logits_t - inv_temp), axis=1, keepdims=True)

            @pl.when(l_idx == n_col_blocks - 1)
            def _finalize():
                row_lse_ref[...] = inv_temp + jnp.log(s0_ref[...])
                col_lse_ref[...] = inv_temp + jnp.log(s1_ref[...])
                diag_ref[...] = _diag(a_k, b_k)

        num_scratch = 2

    else:
        # Flash-style online-max fallback (needed only for tiny temperatures).
        def kernel(a_k_ref, a_l_ref, b_k_ref, b_l_ref,
                   logits_ref, row_lse_ref, col_lse_ref, diag_ref,
                   m0_ref, s0_ref, m1_ref, s1_ref):
            l_idx = pl.program_id(1)
            n_col_blocks = pl.num_programs(1)

            @pl.when(l_idx == 0)
            def _init():
                m0_ref[...] = jnp.full_like(m0_ref, -jnp.inf)
                m1_ref[...] = jnp.full_like(m1_ref, -jnp.inf)
                s0_ref[...] = jnp.zeros_like(s0_ref)
                s1_ref[...] = jnp.zeros_like(s1_ref)

            a_k = a_k_ref[...]
            a_l = a_l_ref[...]
            b_k = b_k_ref[...]
            b_l = b_l_ref[...]

            logits = lax.dot_general(a_k, b_l, nt_dims,
                                     preferred_element_type=jnp.float32) * inv_temp
            logits_t = lax.dot_general(b_k, a_l, nt_dims,
                                       preferred_element_type=jnp.float32) * inv_temp

            logits_ref[...] = logits.astype(logits_ref.dtype)

            def lse_update(m_ref, s_ref, tile):
                m_prev = m_ref[...]
                m_new = jnp.maximum(m_prev, jnp.max(tile, axis=1, keepdims=True))
                s_ref[...] = (s_ref[...] * jnp.exp(m_prev - m_new)
                              + jnp.sum(jnp.exp(tile - m_new), axis=1, keepdims=True))
                m_ref[...] = m_new

            lse_update(m0_ref, s0_ref, logits)
            lse_update(m1_ref, s1_ref, logits_t)

            @pl.when(l_idx == n_col_blocks - 1)
            def _finalize():
                row_lse_ref[...] = m0_ref[...] + jnp.log(s0_ref[...])
                col_lse_ref[...] = m1_ref[...] + jnp.log(s1_ref[...])
                diag_ref[...] = _diag(a_k, b_k)

        num_scratch = 4

    return kernel, num_scratch


def _pick_block(n: int, preferred: int) -> int:
    # Largest "nice" tile that divides n (128/256-multiples keep the logits
    # store lane-dense and fill the 256x256 MXU); fall back to the whole axis
    # for small / odd n.
    for cand in (preferred, 1024, 512, 256, 128):
        if cand <= n and n % cand == 0:
            return cand
    return n


def clip_loss(out0, out1, temperature: float = 0.1, lambda_0: float = 0.5, *,
              block_rows: int | None = None, block_cols: int | None = None,
              use_bf16_matmul: bool = True, use_fixed_max: bool | None = None,
              logits_dtype=jnp.float32):
    """Pallas implementation of CLIPLoss.forward with indices=None.

    Returns (loss [scalar f32], logits [N, N], labels [N] int32).
    """
    n, d = out0.shape
    assert out1.shape == (n, d)
    if lambda_0 > 1.0 or lambda_0 < 0.0:
        raise ValueError("lambda_0 must be a float between 0 and 1.")
    lambda_1 = 1.0 - lambda_0

    # bm is the HBM-traffic knob (input re-reads ~ 1/bm), bn the per-step
    # overhead knob.  NOTE: re-derive per TPU generation for production
    # batches (v7x has 64 MiB VMEM/TC and wants an even nk for megacore).
    bm = block_rows if block_rows is not None else _pick_block(n, 1024)
    bn = block_cols if block_cols is not None else _pick_block(n, 512)
    assert n % bm == 0 and n % bn == 0, "row/col blocks must divide the batch size"
    nk, nl = n // bm, n // bn

    # Fixed-max LSE is exact whenever the per-row max exponential cannot
    # underflow: exp((cos-1)/T) with cos >= -1 never underflows for T >= 2/88.
    if use_fixed_max is None:
        use_fixed_max = temperature >= 0.03

    in_dtype = jnp.bfloat16 if use_bf16_matmul else jnp.float32

    # --- Pre-pass: fused L2-normalize (+ cast) of both embedding matrices. ---
    norm_block = _pick_block(n, 1024)
    a_n = _l2_normalize(out0, in_dtype, norm_block)
    b_n = _l2_normalize(out1, in_dtype, norm_block)

    kernel, num_scratch = _make_clip_loss_kernel(temperature, use_fixed_max)

    # --- Explicit VMEM budget for the chosen tiles (double-buffered). ---
    in_bytes = jnp.dtype(in_dtype).itemsize
    logit_bytes = jnp.dtype(logits_dtype).itemsize
    vmem_needed = (2 * (2 * bm * d + 2 * bn * d) * in_bytes   # 4 input panels x2 bufs
                   + 2 * bm * bn * logit_bytes                # logits tile x2 bufs
                   + 2 * 3 * bm * 4 * 2                       # (bm,1) stat outputs
                   + num_scratch * bm * 4)                    # scratch
    vmem_limit = int(min(96 * 2**20, max(32 * 2**20, int(vmem_needed * 1.5))))

    grid_spec = pltpu.PrefetchScalarGridSpec(
        num_scalar_prefetch=0,
        grid=(nk, nl),
        in_specs=[
            pl.BlockSpec((bm, d), lambda k, l: (k, 0)),  # a_k (out0, row block)
            pl.BlockSpec((bn, d), lambda k, l: (l, 0)),  # a_l (out0, col block)
            pl.BlockSpec((bm, d), lambda k, l: (k, 0)),  # b_k (out1, row block)
            pl.BlockSpec((bn, d), lambda k, l: (l, 0)),  # b_l (out1, col block)
        ],
        out_specs=(
            pl.BlockSpec((bm, bn), lambda k, l: (k, l)),  # logits tile
            pl.BlockSpec((bm, 1), lambda k, l: (k, 0)),   # row logsumexp
            pl.BlockSpec((bm, 1), lambda k, l: (k, 0)),   # column logsumexp
            pl.BlockSpec((bm, 1), lambda k, l: (k, 0)),   # diagonal
        ),
        scratch_shapes=[pltpu.VMEM((bm, 1), jnp.float32)] * num_scratch,
    )

    logits, row_lse, col_lse, diag = pl.pallas_call(
        kernel,
        grid_spec=grid_spec,
        out_shape=(
            jax.ShapeDtypeStruct((n, n), logits_dtype),
            jax.ShapeDtypeStruct((n, 1), jnp.float32),
            jax.ShapeDtypeStruct((n, 1), jnp.float32),
            jax.ShapeDtypeStruct((n, 1), jnp.float32),
        ),
        compiler_params=pltpu.CompilerParams(
            dimension_semantics=("parallel", "arbitrary"),
            vmem_limit_bytes=vmem_limit),
    )(a_n, a_n, b_n, b_n)

    # Tiny O(N) epilogue in plain JAX: weighted mean of per-row CE terms.
    ce0 = jnp.mean(row_lse - diag)          # CE(logits,   eye)
    ce1 = jnp.mean(col_lse - diag)          # CE(logits.T, eye)
    loss = lambda_0 * ce0 + lambda_1 * ce1
    labels = jnp.arange(n, dtype=jnp.int32)
    return loss, logits, labels


# ----------------------------------------------------------------------------
# Reference + tests
# ----------------------------------------------------------------------------
def _clip_loss_ref(out0, out1, temperature, lambda_0):
    """Pure-JAX reference for correctness checking."""
    a = out0 / jnp.maximum(jnp.linalg.norm(out0, axis=1, keepdims=True), 1e-12)
    b = out1 / jnp.maximum(jnp.linalg.norm(out1, axis=1, keepdims=True), 1e-12)
    logits = (a @ b.T) / temperature
    n = logits.shape[0]
    diag = jnp.diag(logits)
    ce0 = jnp.mean(jax.nn.logsumexp(logits, axis=1) - diag)
    ce1 = jnp.mean(jax.nn.logsumexp(logits.T, axis=1) - diag)
    loss = lambda_0 * ce0 + (1.0 - lambda_0) * ce1
    return loss, logits, jnp.arange(n, dtype=jnp.int32)


def _check(n, d, *, block_rows=None, block_cols=None, use_bf16_matmul=True,
           use_fixed_max=None, temperature=0.1, lambda_0=0.5,
           loss_atol=5e-2, loss_rtol=2e-2, logits_atol=8e-2, logits_rtol=2e-2):
    key = jax.random.PRNGKey(0)
    k0, k1 = jax.random.split(key)
    out0 = jax.random.normal(k0, (n, d), dtype=jnp.float32)
    out1 = jax.random.normal(k1, (n, d), dtype=jnp.float32)

    loss, logits, labels = clip_loss(
        out0, out1, temperature, lambda_0,
        block_rows=block_rows, block_cols=block_cols,
        use_bf16_matmul=use_bf16_matmul, use_fixed_max=use_fixed_max)
    jax.block_until_ready((loss, logits, labels))

    loss_ref, logits_ref, labels_ref = _clip_loss_ref(out0, out1, temperature, lambda_0)
    assert jnp.allclose(loss, loss_ref, atol=loss_atol, rtol=loss_rtol), (loss, loss_ref)
    assert jnp.allclose(logits.astype(jnp.float32), logits_ref,
                        atol=logits_atol, rtol=logits_rtol)
    assert jnp.array_equal(labels, labels_ref)


if __name__ == "__main__":
    # Default (bf16 MXU + fixed-max LSE) path on a 2x2 grid of 128x128 tiles.
    _check(256, 128, block_rows=128, block_cols=128, use_bf16_matmul=True)
    # f32 matmul path, default (single-block) tiling.
    _check(256, 128, use_bf16_matmul=False)
    # Tiny full-block fallback (matches the original toy shapes).
    _check(8, 32)
    # Online-max fallback path (used automatically for very small temperatures).
    _check(256, 128, block_rows=128, block_cols=128, use_fixed_max=False)
    print("KERNEL_OK")
</pallas_src>

<mosaic_0001>
module attributes {stable_mosaic.version = 11 : i64} {
  func.func @_normalize_kernel(%arg0: i32, %arg1: memref<256x128xf32, #tpu.memory_space<vmem>>, %arg2: memref<256x128xbf16, #tpu.memory_space<vmem>>) attributes {dimension_semantics = [#tpu.dimension_semantics<parallel>], iteration_bounds = array<i64: 1>, scalar_prefetch = 0 : i64, scratch_operands = 0 : i64, tpu.core_type = #tpu.core_type<tc>, window_params = [{transform_indices = @transform_0, window_bounds = array<i64: 256, 128>}, {transform_indices = @transform_1, window_bounds = array<i64: 256, 128>}]} {
    %c0 = arith.constant 0 : index
    %c0_0 = arith.constant 0 : index
    %0 = vector.load %arg1[%c0, %c0_0] : memref<256x128xf32, #tpu.memory_space<vmem>>, vector<256x128xf32>
    %1 = arith.mulf %0, %0 : vector<256x128xf32>
    %cst = arith.constant dense<0.000000e+00> : vector<256xf32>
    %2 = vector.multi_reduction <add>, %1, %cst [1] : vector<256x128xf32> to vector<256xf32>
    %3 = vector.shape_cast %2 : vector<256xf32> to vector<256x1xf32>
    %cst_1 = arith.constant 1.000000e-24 : f32
    %4 = vector.broadcast %cst_1 : f32 to vector<256x1xf32>
    %5 = arith.maximumf %3, %4 : vector<256x1xf32>
    %6 = math.rsqrt %5 : vector<256x1xf32>
    %7 = vector.broadcast %6 : vector<256x1xf32> to vector<256x128xf32>
    %8 = arith.mulf %0, %7 : vector<256x128xf32>
    %9 = arith.truncf %8 : vector<256x128xf32> to vector<256x128xbf16>
    %c0_2 = arith.constant 0 : index
    %c0_3 = arith.constant 0 : index
    %10 = vector.load %arg2[%c0_2, %c0_3] : memref<256x128xbf16, #tpu.memory_space<vmem>>, vector<256x128xbf16>
    tpu.vector_store %arg2[%c0_2, %c0_3], %9 {strides = array<i32>} : memref<256x128xbf16, #tpu.memory_space<vmem>>, vector<256x128xbf16>,
    return
  }
  func.func @transform_0(%arg0: i32) -> (i32, i32) {
    %c0_i32 = arith.constant 0 : i32
    %c0_i32_0 = arith.constant 0 : i32
    return %arg0, %c0_i32 : i32, i32
  }
  func.func @transform_1(%arg0: i32) -> (i32, i32) {
    %c0_i32 = arith.constant 0 : i32
    %c0_i32_0 = arith.constant 0 : i32
    return %arg0, %c0_i32 : i32, i32
  }
}

</mosaic_0001>

<bundles_post_ra>
// kernel: tpu_custom_call.1
= control target key start
LH: loop header
LB: loop body
LE: loop exit
PB: predicated region body
PF: predicated region fallthrough
CT: control target
= control target key end

     0   :  { %6 = vsyncpa [#allocation3], 0  ;;  %s901_s0 = inlined_call_operand.hbm [shape: f32[256,128], index: 0, kind: input, shape index: {}]   ;;  %s902_s1 = inlined_call_operand.hbm [shape: bf16[256,128], index: 1, kind: output, shape index: {}]  }
   0x1   :  { %7 = vsyncpa [#allocation4], 0  ;;  %s701_s6 = smov [#allocation2]   ;;  %s653_s10 = scalar_lea.hbm %s901_s0, 4096 }
   0x2   :  { %s13_s7 = sshll.u32 %s701_s6, 4  ;;  %p654_p0 = scmp.ne.s32.totalorder %s901_s0, %s653_s10  ;;  %s14_s7 = int_to_ptr.vmem [resolvable:$true] %s13_s7 }
   0x3   :  { %p657_p1 = scmp.lt.u32.totalorder %s653_s10, %s901_s0 }
   0x5   :  { %p659_p2 = pnand %p657_p1, %p654_p0 }
   0x7   :  { %662 = shalt.err (!%p659_p2)
}
   0x8   :  { %s663_s15 = scalar_lea.vmem %s14_s7, 4096  ;;  %p668_p4 = scmp.lt.s32.totalorder %s14_s7, %s14_s7 }
   0x9   :  { %p664_p3 = scmp.ne.s32.totalorder %s14_s7, %s663_s15  ;;  %p669_p5 = scmp.lt.s32.totalorder %s663_s15, %s663_s15 }
   0xb   :  { %p670_p6 = por %p669_p5, %p668_p4 }
   0xd   :  { %p671_p7 = pnand %p670_p6, %p664_p3 }
   0xf   :  { %674 = shalt.err (!%p671_p7)
}
  0x10   :  { %s702_s16 = smov 128   ;;  %s703_s17 = smov 8  }
  0x11   :  { %19 = dma.hbm_to_vmem [thread:$0]  %s901_s0, 4096, %s14_s7, [#allocation3], %s702_s16, %s702_s16, %s703_s17  }
  0x12   :  { %697 = dma.done.wait [#allocation3], 4096  }
  0x13   :  { %698 = vsyncadd [#allocation3], 4294963200  ;;  %v729_v0 = vld [vmem:[#allocation2 + $0x10] sm:$0xff]  ;;  %v731_v1 = vld [vmem:[#allocation2] sm:$0xff]  ;;  %s704_s0 = smov [#allocation5]  }
  0x14   :  { %v733_v2 = vld [vmem:[#allocation2 + $0x18] sm:$0xff]  ;;  %v57_v3 = vmul.f32 %v729_v0, %v729_v0  ;;  %v55_v4 = vmul.f32 %v731_v1, %v731_v1  ;;  %v739_v5 = vld [vmem:[#allocation2 + $0x8] sm:$0xff]  ;;  %v747_v9 = vld [vmem:[#allocation2 + $0x20] sm:$0xff]  ;;  %s412_s20 = sshll.u32 %s704_s0, 4  ;;  %s413_s20 = int_to_ptr.vmem [resolvable:$true] %s412_s20 }
  0x15   :  { %v58_v6 = vmul.f32 %v733_v2, %v733_v2  ;;  %v56_v7 = vmul.f32 %v739_v5, %v739_v5  ;;  %v745_v8 = vld [vmem:[#allocation2 + $0x28] sm:$0xff]  ;;  %v59_v11 = vmul.f32 %v747_v9, %v747_v9  ;;  %v753_v12 = vld [vmem:[#allocation2 + $0x38] sm:$0xff]  ;;  %v755_v13 = vld [vmem:[#allocation2 + $0x30] sm:$0xff]  ;;  %s675_s21 = scalar_lea.vmem %s413_s20, 2048  ;;  %p680_p9 = scmp.lt.s32.totalorder %s413_s20, %s413_s20 }
  0x16   :  { %91 = vadd.xlane.f32.xlu1 %v57_v3  ;;  %87 = vadd.xlane.f32.xlu0 %v55_v4  ;;  %v60_v10 = vmul.f32 %v745_v8, %v745_v8  ;;  %v62_v14 = vmul.f32 %v753_v12, %v753_v12  ;;  %v61_v15 = vmul.f32 %v755_v13, %v755_v13  ;;  %v761_v16 = vld [vmem:[#allocation2 + $0x48] sm:$0xff]  ;;  %v763_v17 = vld [vmem:[#allocation2 + $0x40] sm:$0xff]  ;;  %v769_v20 = vld [vmem:[#allocation2 + $0x58] sm:$0xff]  ;;  %p676_p8 = scmp.ne.s32.totalorder %s413_s20, %s675_s21  ;;  %p681_p10 = scmp.lt.s32.totalorder %s675_s21, %s675_s21 }
  0x17   :  { %v64_v18 = vmul.f32 %v761_v16, %v761_v16  ;;  %v63_v19 = vmul.f32 %v763_v17, %v763_v17  ;;  %v771_v21 = vld [vmem:[#allocation2 + $0x50] sm:$0xff]  ;;  %v66_v22 = vmul.f32 %v769_v20, %v769_v20  ;;  %v777_v24 = vld [vmem:[#allocation2 + $0x68] sm:$0xff]  ;;  %v779_v25 = vld [vmem:[#allocation2 + $0x60] sm:$0xff] }
  0x18   :  { %v65_v23 = vmul.f32 %v771_v21, %v771_v21  ;;  %v68_v26 = vmul.f32 %v777_v24, %v777_v24  ;;  %v67_v27 = vmul.f32 %v779_v25, %v779_v25  ;;  %v785_v28 = vld [vmem:[#allocation2 + $0x78] sm:$0xff]  ;;  %v787_v29 = vld [vmem:[#allocation2 + $0x70] sm:$0xff]  ;;  %v793_v32 = vld [vmem:[#allocation2 + $0x88] sm:$0xff]  ;;  %p682_p11 = por %p681_p10, %p680_p9 }
  0x19   :  { %v70_v30 = vmul.f32 %v785_v28, %v785_v28  ;;  %v69_v31 = vmul.f32 %v787_v29, %v787_v29  ;;  %v795_v33 = vld [vmem:[#allocation2 + $0x80] sm:$0xff]  ;;  %v72_v34 = vmul.f32 %v793_v32, %v793_v32  ;;  %v801_v36 = vld [vmem:[#allocation2 + $0x98] sm:$0xff]  ;;  %v803_v37 = vld [vmem:[#allocation2 + $0x90] sm:$0xff] }
  0x1a   :  { %93 = vadd.xlane.f32.xlu1 %v58_v6  ;;  %89 = vadd.xlane.f32.xlu0 %v56_v7  ;;  %v71_v35 = vmul.f32 %v795_v33, %v795_v33  ;;  %v74_v38 = vmul.f32 %v801_v36, %v801_v36  ;;  %v73_v39 = vmul.f32 %v803_v37, %v803_v37  ;;  %v809_v40 = vld [vmem:[#allocation2 + $0xa8] sm:$0xff]  ;;  %v811_v41 = vld [vmem:[#allocation2 + $0xa0] sm:$0xff]  ;;  %v817_v44 = vld [vmem:[#allocation2 + $0xb8] sm:$0xff]  ;;  %p683_p12 = pnand %p682_p11, %p676_p8 }
  0x1b   :  { %v76_v42 = vmul.f32 %v809_v40, %v809_v40  ;;  %v75_v43 = vmul.f32 %v811_v41, %v811_v41  ;;  %v819_v45 = vld [vmem:[#allocation2 + $0xb0] sm:$0xff]  ;;  %v78_v46 = vmul.f32 %v817_v44, %v817_v44  ;;  %v825_v48 = vld [vmem:[#allocation2 + $0xc8] sm:$0xff]  ;;  %v827_v49 = vld [vmem:[#allocation2 + $0xc0] sm:$0xff] }
  0x1c   :  { %v77_v47 = vmul.f32 %v819_v45, %v819_v45  ;;  %v80_v50 = vmul.f32 %v825_v48, %v825_v48  ;;  %v79_v51 = vmul.f32 %v827_v49, %v827_v49  ;;  %v833_v52 = vld [vmem:[#allocation2 + $0xd8] sm:$0xff]  ;;  %v835_v53 = vld [vmem:[#allocation2 + $0xd0] sm:$0xff]  ;;  %v841_v56 = vld [vmem:[#allocation2 + $0xe8] sm:$0xff] }
  0x1d   :  { %v82_v54 = vmul.f32 %v833_v52, %v833_v52  ;;  %v81_v55 = vmul.f32 %v835_v53, %v835_v53  ;;  %v843_v57 = vld [vmem:[#allocation2 + $0xe0] sm:$0xff]  ;;  %v84_v58 = vmul.f32 %v841_v56, %v841_v56  ;;  %v849_v60 = vld [vmem:[#allocation2 + $0xf8] sm:$0xff]  ;;  %v851_v61 = vld [vmem:[#allocation2 + $0xf0] sm:$0xff] }
  0x1e   :  { %97 = vadd.xlane.f32.xlu1 %v60_v10  ;;  %95 = vadd.xlane.f32.xlu0 %v59_v11  ;;  %v83_v59 = vmul.f32 %v843_v57, %v843_v57  ;;  %v86_v62 = vmul.f32 %v849_v60, %v849_v60  ;;  %v85_v63 = vmul.f32 %v851_v61, %v851_v61 }
  0x22   :  { %101 = vadd.xlane.f32.xlu1 %v62_v14  ;;  %99 = vadd.xlane.f32.xlu0 %v61_v15 }
  0x26   :  { %105 = vadd.xlane.f32.xlu1 %v64_v18  ;;  %103 = vadd.xlane.f32.xlu0 %v63_v19 }
  0x2a   :  { %109 = vadd.xlane.f32.xlu1 %v66_v22  ;;  %107 = vadd.xlane.f32.xlu0 %v65_v23 }
  0x2e   :  { %113 = vadd.xlane.f32.xlu1 %v68_v26  ;;  %111 = vadd.xlane.f32.xlu0 %v67_v27 }
  0x32   :  { %117 = vadd.xlane.f32.xlu1 %v70_v30  ;;  %115 = vadd.xlane.f32.xlu0 %v69_v31 }
  0x36   :  { %121 = vadd.xlane.f32.xlu1 %v72_v34  ;;  %119 = vadd.xlane.f32.xlu0 %v71_v35 }
  0x3a   :  { %125 = vadd.xlane.f32.xlu1 %v74_v38  ;;  %123 = vadd.xlane.f32.xlu0 %v73_v39 }
  0x3e   :  { %129 = vadd.xlane.f32.xlu1 %v76_v42  ;;  %127 = vadd.xlane.f32.xlu0 %v75_v43 }
  0x42   :  { %133 = vadd.xlane.f32.xlu1 %v78_v46  ;;  %131 = vadd.xlane.f32.xlu0 %v77_v47 }
  0x46   :  { %137 = vadd.xlane.f32.xlu1 %v80_v50  ;;  %135 = vadd.xlane.f32.xlu0 %v79_v51 }
  0x4a   :  { %141 = vadd.xlane.f32.xlu1 %v82_v54  ;;  %139 = vadd.xlane.f32.xlu0 %v81_v55 }
  0x4e   :  { %145 = vadd.xlane.f32.xlu1 %v84_v58  ;;  %143 = vadd.xlane.f32.xlu0 %v83_v59 }
  0x52   :  { %149 = vadd.xlane.f32.xlu1 %v86_v62  ;;  %147 = vadd.xlane.f32.xlu0 %v85_v63 }
  0xa3   :  { %v92_v3 = vpop.xlane.xlu1 %91  ;;  %v88_v4 = vpop.xlane.xlu0 %87 }
  0xa4   :  { %v153_v6 = vmax.f32 %v92_v3, 1e-24  ;;  %v151_v7 = vmax.f32 %v88_v4, 1e-24 }
  0xa6   :  { %589 = vrsqrt.f32 %v153_v6 }
  0xa7   :  { %v94_v10 = vpop.xlane.xlu1 %93  ;;  %v90_v11 = vpop.xlane.xlu0 %89  ;;  %591 = vrsqrt.f32 %v151_v7 }
  0xa8   :  { %v154_v14 = vmax.f32 %v94_v10, 1e-24  ;;  %v152_v15 = vmax.f32 %v90_v11, 1e-24 }
  0xaa   :  { %593 = vrsqrt.f32 %v154_v14 }
  0xab   :  { %595 = vrsqrt.f32 %v152_v15  ;;  %v98_v18 = vpop.xlane.xlu1 %97  ;;  %v96_v19 = vpop.xlane.xlu0 %95 }
  0xac   :  { %v156_v22 = vmax.f32 %v98_v18, 1e-24  ;;  %v155_v23 = vmax.f32 %v96_v19, 1e-24 }
  0xae   :  { %597 = vrsqrt.f32 %v156_v22 }
  0xaf   :  { %599 = vrsqrt.f32 %v155_v23  ;;  %v102_v26 = vpop.xlane.xlu1 %101  ;;  %v100_v27 = vpop.xlane.xlu0 %99 }
  0xb0   :  { %v158_v30 = vmax.f32 %v102_v26, 1e-24  ;;  %v157_v31 = vmax.f32 %v100_v27, 1e-24  ;;  %v590_v34 = vpop.eup %589 }
  0xb1   :  { %v592_v35 = vpop.eup %591  ;;  %v217_v50 = vmul.f32 %v590_v34, %v729_v0 }
  0xb2   :  { %601 = vrsqrt.f32 %v158_v30  ;;  %v215_v54 = vmul.f32 %v592_v35, %v731_v1 }
  0xb3   :  { %603 = vrsqrt.f32 %v157_v31  ;;  %v106_v38 = vpop.xlane.xlu1 %105  ;;  %v104_v39 = vpop.xlane.xlu0 %103 }
  0xb4   :  { %v594_v42 = vpop.eup %593  ;;  %v160_v43 = vmax.f32 %v106_v38, 1e-24  ;;  %v159_v46 = vmax.f32 %v104_v39, 1e-24 }
  0xb5   :  { %v596_v47 = vpop.eup %595  ;;  %v218_v51 = vmul.f32 %v594_v42, %v733_v2 }
  0xb6   :  { %v216_v55 = vmul.f32 %v596_v47, %v739_v5  ;;  %605 = vrsqrt.f32 %v160_v43 }
  0xb7   :  { %v496_v58 = vpack.c.bf16 %v218_v51, %v217_v50  ;;  %607 = vrsqrt.f32 %v159_v46  ;;  %v110_v59 = vpop.xlane.xlu1 %109  ;;  %v108_v62 = vpop.xlane.xlu0 %107 }
  0xb8   :  { %v598_v63 = vpop.eup %597  ;;  %v491_v3 = vpack.c.bf16 %v216_v55, %v215_v54  ;;  %v162_v4 = vmax.f32 %v110_v59, 1e-24  ;;  %v161_v6 = vmax.f32 %v108_v62, 1e-24 }
  0xb9   :  { %v600_v7 = vpop.eup %599  ;;  %568 = vst [vmem:[#allocation5 + $0x8] sm:$0xff] %v496_v58   ;;  %v220_v10 = vmul.f32 %v598_v63, %v745_v8 }
  0xba   :  { %492 = vst [vmem:[#allocation5] sm:$0xff] %v491_v3   ;;  %v219_v0 = vmul.f32 %v600_v7, %v747_v9  ;;  %609 = vrsqrt.f32 %v162_v4 }
  0xbb   :  { %611 = vrsqrt.f32 %v161_v6  ;;  %v114_v1 = vpop.xlane.xlu1 %113  ;;  %v112_v2 = vpop.xlane.xlu0 %111 }
  0xbc   :  { %v602_v5 = vpop.eup %601  ;;  %v501_v11 = vpack.c.bf16 %v220_v10, %v219_v0  ;;  %v164_v14 = vmax.f32 %v114_v1, 1e-24  ;;  %v163_v15 = vmax.f32 %v112_v2, 1e-24 }
  0xbd   :  { %v604_v18 = vpop.eup %603  ;;  %v222_v19 = vmul.f32 %v602_v5, %v753_v12 }
  0xbe   :  { %569 = vst [vmem:[#allocation5 + $0x10] sm:$0xff] %v501_v11   ;;  %v221_v22 = vmul.f32 %v604_v18, %v755_v13  ;;  %613 = vrsqrt.f32 %v164_v14 }
  0xbf   :  { %615 = vrsqrt.f32 %v163_v15  ;;  %v118_v8 = vpop.xlane.xlu1 %117  ;;  %v116_v23 = vpop.xlane.xlu0 %115 }
  0xc0   :  { %v606_v26 = vpop.eup %605  ;;  %v506_v9 = vpack.c.bf16 %v222_v19, %v221_v22  ;;  %v166_v27 = vmax.f32 %v118_v8, 1e-24  ;;  %v165_v30 = vmax.f32 %v116_v23, 1e-24 }
  0xc1   :  { %v608_v31 = vpop.eup %607  ;;  %v224_v34 = vmul.f32 %v606_v26, %v761_v16 }
  0xc2   :  { %570 = vst [vmem:[#allocation5 + $0x18] sm:$0xff] %v506_v9   ;;  %v223_v35 = vmul.f32 %v608_v31, %v763_v17  ;;  %617 = vrsqrt.f32 %v166_v27 }
  0xc3   :  { %619 = vrsqrt.f32 %v165_v30  ;;  %v122_v12 = vpop.xlane.xlu1 %121  ;;  %v120_v38 = vpop.xlane.xlu0 %119 }
  0xc4   :  { %v610_v39 = vpop.eup %609  ;;  %v511_v13 = vpack.c.bf16 %v224_v34, %v223_v35  ;;  %v168_v42 = vmax.f32 %v122_v12, 1e-24  ;;  %v167_v43 = vmax.f32 %v120_v38, 1e-24 }
  0xc5   :  { %v612_v46 = vpop.eup %611  ;;  %v226_v47 = vmul.f32 %v610_v39, %v769_v20 }
  0xc6   :  { %571 = vst [vmem:[#allocation5 + $0x20] sm:$0xff] %v511_v13   ;;  %v225_v50 = vmul.f32 %v612_v46, %v771_v21  ;;  %621 = vrsqrt.f32 %v168_v42 }
  0xc7   :  { %623 = vrsqrt.f32 %v167_v43  ;;  %v126_v16 = vpop.xlane.xlu1 %125  ;;  %v124_v51 = vpop.xlane.xlu0 %123 }
  0xc8   :  { %v614_v54 = vpop.eup %613  ;;  %v516_v17 = vpack.c.bf16 %v226_v47, %v225_v50  ;;  %v170_v55 = vmax.f32 %v126_v16, 1e-24  ;;  %v169_v58 = vmax.f32 %v124_v51, 1e-24 }
  0xc9   :  { %v616_v59 = vpop.eup %615  ;;  %v228_v62 = vmul.f32 %v614_v54, %v777_v24 }
  0xca   :  { %572 = vst [vmem:[#allocation5 + $0x28] sm:$0xff] %v516_v17   ;;  %v227_v63 = vmul.f32 %v616_v59, %v779_v25  ;;  %625 = vrsqrt.f32 %v170_v55 }
  0xcb   :  { %627 = vrsqrt.f32 %v169_v58  ;;  %v130_v20 = vpop.xlane.xlu1 %129  ;;  %v128_v3 = vpop.xlane.xlu0 %127 }
  0xcc   :  { %v618_v4 = vpop.eup %617  ;;  %v521_v21 = vpack.c.bf16 %v228_v62, %v227_v63  ;;  %v172_v6 = vmax.f32 %v130_v20, 1e-24  ;;  %v171_v7 = vmax.f32 %v128_v3, 1e-24 }
  0xcd   :  { %v620_v10 = vpop.eup %619  ;;  %v230_v0 = vmul.f32 %v618_v4, %v785_v28 }
  0xce   :  { %573 = vst [vmem:[#allocation5 + $0x30] sm:$0xff] %v521_v21   ;;  %v229_v1 = vmul.f32 %v620_v10, %v787_v29  ;;  %629 = vrsqrt.f32 %v172_v6 }
  0xcf   :  { %631 = vrsqrt.f32 %v171_v7  ;;  %v134_v24 = vpop.xlane.xlu1 %133  ;;  %v132_v2 = vpop.xlane.xlu0 %131 }
  0xd0   :  { %v622_v5 = vpop.eup %621  ;;  %v526_v25 = vpack.c.bf16 %v230_v0, %v229_v1  ;;  %v174_v11 = vmax.f32 %v134_v24, 1e-24  ;;  %v173_v14 = vmax.f32 %v132_v2, 1e-24 }
  0xd1   :  { %v624_v15 = vpop.eup %623  ;;  %v232_v18 = vmul.f32 %v622_v5, %v793_v32 }
  0xd2   :  { %574 = vst [vmem:[#allocation5 + $0x38] sm:$0xff] %v526_v25   ;;  %v231_v19 = vmul.f32 %v624_v15, %v795_v33  ;;  %633 = vrsqrt.f32 %v174_v11 }
  0xd3   :  { %635 = vrsqrt.f32 %v173_v14  ;;  %v138_v28 = vpop.xlane.xlu1 %137  ;;  %v136_v22 = vpop.xlane.xlu0 %135 }
  0xd4   :  { %v626_v8 = vpop.eup %625  ;;  %v531_v29 = vpack.c.bf16 %v232_v18, %v231_v19  ;;  %v176_v23 = vmax.f32 %v138_v28, 1e-24  ;;  %v175_v26 = vmax.f32 %v136_v22, 1e-24 }
  0xd5   :  { %v628_v9 = vpop.eup %627  ;;  %v234_v27 = vmul.f32 %v626_v8, %v801_v36 }
  0xd6   :  { %575 = vst [vmem:[#allocation5 + $0x40] sm:$0xff] %v531_v29   ;;  %v233_v30 = vmul.f32 %v628_v9, %v803_v37  ;;  %637 = vrsqrt.f32 %v176_v23 }
  0xd7   :  { %639 = vrsqrt.f32 %v175_v26  ;;  %v142_v32 = vpop.xlane.xlu1 %141  ;;  %v140_v31 = vpop.xlane.xlu0 %139 }
  0xd8   :  { %v630_v34 = vpop.eup %629  ;;  %v536_v33 = vpack.c.bf16 %v234_v27, %v233_v30  ;;  %v178_v35 = vmax.f32 %v142_v32, 1e-24  ;;  %v177_v12 = vmax.f32 %v140_v31, 1e-24 }
  0xd9   :  { %v632_v38 = vpop.eup %631  ;;  %v236_v39 = vmul.f32 %v630_v34, %v809_v40 }
  0xda   :  { %576 = vst [vmem:[#allocation5 + $0x48] sm:$0xff] %v536_v33   ;;  %v235_v13 = vmul.f32 %v632_v38, %v811_v41  ;;  %641 = vrsqrt.f32 %v178_v35 }
  0xdb   :  { %643 = vrsqrt.f32 %v177_v12  ;;  %v146_v36 = vpop.xlane.xlu1 %145  ;;  %v144_v42 = vpop.xlane.xlu0 %143 }
  0xdc   :  { %v634_v43 = vpop.eup %633  ;;  %v541_v37 = vpack.c.bf16 %v236_v39, %v235_v13  ;;  %v180_v46 = vmax.f32 %v146_v36, 1e-24  ;;  %v179_v47 = vmax.f32 %v144_v42, 1e-24 }
  0xdd   :  { %v636_v50 = vpop.eup %635  ;;  %v238_v16 = vmul.f32 %v634_v43, %v817_v44 }
  0xde   :  { %577 = vst [vmem:[#allocation5 + $0x50] sm:$0xff] %v541_v37   ;;  %v237_v51 = vmul.f32 %v636_v50, %v819_v45  ;;  %645 = vrsqrt.f32 %v180_v46 }
  0xdf   :  { %647 = vrsqrt.f32 %v179_v47  ;;  %v150_v40 = vpop.xlane.xlu1 %149  ;;  %v148_v54 = vpop.xlane.xlu0 %147 }
  0xe0   :  { %v638_v17 = vpop.eup %637  ;;  %v546_v41 = vpack.c.bf16 %v238_v16, %v237_v51  ;;  %v182_v55 = vmax.f32 %v150_v40, 1e-24  ;;  %v181_v58 = vmax.f32 %v148_v54, 1e-24 }
  0xe1   :  { %v640_v59 = vpop.eup %639  ;;  %v240_v62 = vmul.f32 %v638_v17, %v825_v48 }
  0xe2   :  { %578 = vst [vmem:[#allocation5 + $0x58] sm:$0xff] %v546_v41   ;;  %v239_v63 = vmul.f32 %v640_v59, %v827_v49  ;;  %649 = vrsqrt.f32 %v182_v55 }
  0xe3   :  { %651 = vrsqrt.f32 %v181_v58 }
  0xe4   :  { %v642_v44 = vpop.eup %641  ;;  %v551_v20 = vpack.c.bf16 %v240_v62, %v239_v63 }
  0xe5   :  { %v644_v3 = vpop.eup %643  ;;  %v242_v45 = vmul.f32 %v642_v44, %v833_v52 }
  0xe6   :  { %579 = vst [vmem:[#allocation5 + $0x60] sm:$0xff] %v551_v20   ;;  %v241_v4 = vmul.f32 %v644_v3, %v835_v53 }
  0xe8   :  { %v646_v21 = vpop.eup %645  ;;  %v556_v6 = vpack.c.bf16 %v242_v45, %v241_v4 }
  0xe9   :  { %v648_v7 = vpop.eup %647  ;;  %v244_v10 = vmul.f32 %v646_v21, %v841_v56 }
  0xea   :  { %580 = vst [vmem:[#allocation5 + $0x68] sm:$0xff] %v556_v6   ;;  %v243_v48 = vmul.f32 %v648_v7, %v843_v57 }
  0xec   :  { %v650_v0 = vpop.eup %649  ;;  %v561_v49 = vpack.c.bf16 %v244_v10, %v243_v48 }
  0xed   :  { %v652_v1 = vpop.eup %651  ;;  %v246_v24 = vmul.f32 %v650_v0, %v849_v60 }
  0xee   :  { %581 = vst [vmem:[#allocation5 + $0x70] sm:$0xff] %v561_v49   ;;  %v245_v52 = vmul.f32 %v652_v1, %v851_v61 }
  0xf0   :  { %v566_v53 = vpack.c.bf16 %v246_v24, %v245_v52 }
  0xf2   :  { %582 = vst [vmem:[#allocation5 + $0x78] sm:$0xff] %v566_v53  }
  0xf3   :  { %686 = shalt.err (!%p683_p12)
}
  0xf4   :  { %s687_s24 = scalar_lea.hbm %s902_s1, 2048 }
  0xf5   :  { %p688_p13 = scmp.ne.s32.totalorder %s902_s1, %s687_s24  ;;  %p691_p0 = scmp.lt.u32.totalorder %s687_s24, %s902_s1 }
  0xf7   :  { %p693_p1 = pnand %p691_p0, %p688_p13 }
  0xf9   :  { %696 = shalt.err (!%p693_p1)
}
  0xfa   :  { %s705_s29 = smov 64   ;;  %s706_s30 = smov 4  }
  0xfb   :  { %418 = dma.vmem_to_hbm [thread:$0]  %s413_s20, 2048, %s902_s1, [#allocation4], %s705_s29, %s705_s29, %s706_s30  }
  0xfc   :  { %699 = dma.done.wait [#allocation4], 2048  }
  0xfd   :  { %700 = vsyncadd [#allocation4], 4294965248 }
  0xfe   :  { %422 = vsyncpa [#allocation3], 1 }
  0xff   :  { %423 = vsyncpa [#allocation4], 1 }

</bundles_post_ra>
